<compile_context>
chip_gen: v5e
topology: v5e:2x2
jax: 0.10.0
libtpu: 0.0.40
codegen_flags: <defaults>
</compile_context>

<pallas_src>
import functools

import jax
import jax.numpy as jnp
from jax.experimental import pallas as pl
from jax.experimental.pallas import tpu as pltpu

IN_F = 8                 # fc1 in_features
TILE_SAMPLES = 65536     # target samples per grid step (~4.5 MB payload/step)


def _round_up(n, m):
    return ((n + m - 1) // m) * m


def default_pack():
    """Lane-packing factor per TPU generation.

    64 on v6e/v7x (512-in / 640-out lanes, exact multiples of 128, unmasked
    stores); 16 elsewhere (v5e and older) where PACK=64's extra padded MACs
    could flip this HBM-bound kernel into an MXU-bound one.
    """
    try:
        kind = jax.devices()[0].device_kind.lower()
    except Exception:
        return 16
    return 64 if ("v6" in kind or "v7" in kind) else 16


def _fused_mlp_kernel(x_ref, w_ref, b_ref, out_ref):
    # Single lane-dense MXU matmul (tile, PACK*8) x (PACK*8, PACK*NC) + bias.
    out_ref[...] = (
        jnp.dot(x_ref[...], w_ref[...], preferred_element_type=jnp.float32)
        + b_ref[...]
    )


def prepare_fused_weights(params, pack):
    """One-time: fuse the two Linear layers and build the packed weights."""
    w1_t = params["fc1_w"].T.astype(jnp.float32)      # (8, 4)
    w2_t = params["fc2_w"].T.astype(jnp.float32)      # (4, NC)
    b1 = params["fc1_b"].astype(jnp.float32)           # (4,)
    b2 = params["fc2_b"].astype(jnp.float32)           # (NC,)
    nc = w2_t.shape[1]

    w_fused = w1_t @ w2_t                               # (8, NC)
    b_fused = b1 @ w2_t + b2                            # (NC,)

    # Block-diagonal weight: PACK copies of w_fused -> (PACK*8, PACK*NC).
    eye = jnp.eye(pack, dtype=jnp.float32)
    w_bd = jnp.einsum("pq,io->piqo", eye, w_fused).reshape(
        pack * IN_F, pack * nc)
    b_bd = jnp.tile(b_fused, pack)[None, :]             # (1, PACK*NC)
    return w_bd, b_bd


def _pick_tile(n_packed, pack):
    """Packed rows per grid step: big (amortize per-step overhead), multiple
    of 8 (sublane), capped so the grid has >= 2 steps for v7x's two TCs."""
    tile_cap = max(8, TILE_SAMPLES // pack)
    if n_packed <= 8:
        return n_packed            # single block; equals full array dim
    half = _round_up(pl.cdiv(n_packed, 2), 8)
    return min(tile_cap, half)


def net_forward(x, w_bd, b_bd, pack):
    """x: (B, 8).  Returns (B, num_class) float32 == fc2(fc1(x))."""
    B = x.shape[0]
    nc = w_bd.shape[1] // pack
    x = x.astype(jnp.float32)

    n_packed = pl.cdiv(B, pack)
    b_packed = n_packed * pack

    # Zero-copy reshape when B % PACK == 0; otherwise pad only the ragged
    # tail (< PACK samples) -- never round up to a full tile.
    if b_packed != B:
        x = jnp.pad(x, ((0, b_packed - B), (0, 0)))
    x_packed = x.reshape(n_packed, pack * IN_F)

    tile = _pick_tile(n_packed, pack)
    grid = (pl.cdiv(n_packed, tile),)   # partial last block: writes are masked

    out_packed = pl.pallas_call(
        _fused_mlp_kernel,
        out_shape=jax.ShapeDtypeStruct((n_packed, pack * nc), jnp.float32),
        grid=grid,
        in_specs=[
            pl.BlockSpec((tile, pack * IN_F), lambda i: (i, 0)),
            pl.BlockSpec((pack * IN_F, pack * nc), lambda i: (0, 0)),  # resident
            pl.BlockSpec((1, pack * nc), lambda i: (0, 0)),            # resident
        ],
        out_specs=pl.BlockSpec((tile, pack * nc), lambda i: (i, 0)),
        compiler_params=pltpu.CompilerParams(
            dimension_semantics=("parallel",)),
    )(x_packed, w_bd, b_bd)

    # (Np, PACK*NC) -> (Np*PACK, NC): free contiguous reshape; slice only in
    # the ragged case (pad rows held bias values and are dropped here).
    out = out_packed.reshape(b_packed, nc)
    return out if b_packed == B else out[:B]


def init_params(key, num_class=10):
    """Deterministic init matching nn.Linear (PyTorch (out, in) weights)."""
    k1, k2, k3, k4 = jax.random.split(key, 4)

    def uni(k, shape, fan_in):
        bound = 1.0 / jnp.sqrt(jnp.float32(fan_in))
        return jax.random.uniform(k, shape, jnp.float32, -bound, bound)

    return {
        "fc1_w": uni(k1, (4, 8), 8),
        "fc1_b": uni(k2, (4,), 8),
        "fc2_w": uni(k3, (num_class, 4), 4),
        "fc2_b": uni(k4, (num_class,), 4),
    }


if __name__ == "__main__":
    key = jax.random.PRNGKey(0)
    pkey, xk1, xk2 = jax.random.split(key, 3)

    num_class = 10
    params = init_params(pkey, num_class=num_class)

    pack = default_pack()
    w_bd, b_bd = prepare_fused_weights(params, pack)   # built once, reused

    fwd = jax.jit(net_forward, static_argnames=("pack",))

    def ref(xx):
        h = xx @ params["fc1_w"].T + params["fc1_b"]
        return h @ params["fc2_w"].T + params["fc2_b"]

    # B=256 exercises the zero-copy (B % PACK == 0) path; B=37 the ragged-tail
    # minimal-pad path.
    for B, xk in ((256, xk1), (37, xk2)):
        x = jax.random.normal(xk, (B, IN_F), jnp.float32)
        out = jax.block_until_ready(fwd(x, w_bd, b_bd, pack=pack))
        y = ref(x)
        assert out.shape == (B, num_class), out.shape
        assert jnp.allclose(out, y, atol=1e-5, rtol=1e-5), (
            B, float(jnp.max(jnp.abs(out - y))))

    print("KERNEL_OK")
</pallas_src>

<mosaic_0001>
module attributes {stable_mosaic.version = 11 : i64} {
  func.func @_fused_mlp_kernel(%arg0: i32, %arg1: memref<8x128xf32, #tpu.memory_space<vmem>>, %arg2: memref<128x160xf32, #tpu.memory_space<vmem>>, %arg3: memref<1x160xf32, #tpu.memory_space<vmem>>, %arg4: memref<8x160xf32, #tpu.memory_space<vmem>>) attributes {dimension_semantics = [#tpu.dimension_semantics<parallel>], iteration_bounds = array<i64: 2>, scalar_prefetch = 0 : i64, scratch_operands = 0 : i64, tpu.core_type = #tpu.core_type<tc>, window_params = [{transform_indices = @transform_0, window_bounds = array<i64: 8, 128>}, {pipeline_mode = #tpu.pipeline_mode<synchronous>, transform_indices = @transform_1, window_bounds = array<i64: 128, 160>}, {pipeline_mode = #tpu.pipeline_mode<synchronous>, transform_indices = @transform_2, window_bounds = array<i64: 1, 160>}, {transform_indices = @transform_3, window_bounds = array<i64: 8, 160>}]} {
    %c0 = arith.constant 0 : index
    %c0_0 = arith.constant 0 : index
    %0 = vector.load %arg1[%c0, %c0_0] : memref<8x128xf32, #tpu.memory_space<vmem>>, vector<8x128xf32>
    %c0_1 = arith.constant 0 : index
    %c0_2 = arith.constant 0 : index
    %1 = vector.load %arg2[%c0_1, %c0_2] : memref<128x160xf32, #tpu.memory_space<vmem>>, vector<128x160xf32>
    %cst = arith.constant dense<0.000000e+00> : vector<8x160xf32>
    %2 = tpu.matmul %0, %1, %cst {dimension_numbers = #tpu.dot_dimension_numbers<[1], [0], [0], [1], [0, 0, 1, 1], [], []>} : vector<8x128xf32>, vector<128x160xf32>, vector<8x160xf32> -> vector<8x160xf32>
    %c0_3 = arith.constant 0 : index
    %c0_4 = arith.constant 0 : index
    %3 = vector.load %arg3[%c0_3, %c0_4] : memref<1x160xf32, #tpu.memory_space<vmem>>, vector<1x160xf32>
    %4 = vector.broadcast %3 : vector<1x160xf32> to vector<8x160xf32>
    %5 = arith.addf %2, %4 : vector<8x160xf32>
    %c0_5 = arith.constant 0 : index
    %c0_6 = arith.constant 0 : index
    %6 = vector.load %arg4[%c0_5, %c0_6] : memref<8x160xf32, #tpu.memory_space<vmem>>, vector<8x160xf32>
    tpu.vector_store %arg4[%c0_5, %c0_6], %5 {strides = array<i32>} : memref<8x160xf32, #tpu.memory_space<vmem>>, vector<8x160xf32>,
    return
  }
  func.func @transform_0(%arg0: i32) -> (i32, i32) {
    %c0_i32 = arith.constant 0 : i32
    %c0_i32_0 = arith.constant 0 : i32
    return %arg0, %c0_i32 : i32, i32
  }
  func.func @transform_1(%arg0: i32) -> (i32, i32) {
    %c0_i32 = arith.constant 0 : i32
    %c0_i32_0 = arith.constant 0 : i32
    %c0_i32_1 = arith.constant 0 : i32
    return %c0_i32, %c0_i32_0 : i32, i32
  }
  func.func @transform_2(%arg0: i32) -> (i32, i32) {
    %c0_i32 = arith.constant 0 : i32
    %c0_i32_0 = arith.constant 0 : i32
    %c0_i32_1 = arith.constant 0 : i32
    return %c0_i32, %c0_i32_0 : i32, i32
  }
  func.func @transform_3(%arg0: i32) -> (i32, i32) {
    %c0_i32 = arith.constant 0 : i32
    %c0_i32_0 = arith.constant 0 : i32
    return %arg0, %c0_i32 : i32, i32
  }
}

</mosaic_0001>

<bundles_post_ra>
// kernel: net_forward.1
= control target key start
LH: loop header
LB: loop body
LE: loop exit
PB: predicated region body
PF: predicated region fallthrough
CT: control target
= control target key end

     0   :  { %s352_s12 = smov 0   ;;  %s476_s0 = inlined_call_operand.vmem [shape: f32[16,128], index: 0, kind: input, shape index: {}]   ;;  %s477_s1 = inlined_call_operand.vmem [shape: f32[128,160], index: 1, kind: input, shape index: {}]   ;;  %s478_s2 = inlined_call_operand.vmem [shape: f32[1,160], index: 2, kind: input, shape index: {}]   ;;  %s479_s3 = inlined_call_operand.vmem [shape: f32[16,160], index: 3, kind: output, shape index: {}]  }
   0x1 LB: > { %s305_s13 = sadd.s32 4294967295, %s330_s12   ;;  %p309_p0 = scmp.ge.s32.totalorder %s330_s12, 1  ;;  %s330_s12 = sphi %s352_s12, %s13_s12  }
   0x2   : > { %p136_p1 = scmp.lt.s32.totalorder %s330_s12, 3 }
   0x4   : > { %p137_p2 = pnand %p309_p0, %p136_p1 }
   0x5   : > { %p159_p3 = scmp.lt.s32.totalorder (!%p137_p2), %s305_s13, 1 }
   0x6   : > { %140 = sbr.rel (%p137_p2) target bundleno = 173 (0xad), region = 32 }
   0xb   : > { %v199_v0 = vld [vmem:[%s477_s1 + $0xf0] sm:$0xff]  ;;  %v200_v1 = vld [vmem:[%s477_s1 + $0xf8] sm:$0xff]  ;;  %v197_v2 = vld [vmem:[%s477_s1 + $0xe0] sm:$0xff]  ;;  %s481_s13 = smov (!%p159_p3, %s305_s13), 1  ;;  %vm248_vm0 = vcmask 261120  }
   0xc   : > { %207 = vmatpush.msra.mxu0 %v199_v0  ;;  %227 = vmatpush.msra.mxu1 %v200_v1  ;;  %v198_v3 = vld [vmem:[%s477_s1 + $0xe8] sm:$0xff]  ;;  %v195_v4 = vld [vmem:[%s477_s1 + $0xd0] sm:$0xff]  ;;  %v196_v5 = vld [vmem:[%s477_s1 + $0xd8] sm:$0xff]  ;;  %s310_s16 = sshll.u32 %s481_s13, 3  ;;  %s315_s7 = sshll.u32 %s481_s13, 4 }
   0xd   : > { %v193_v6 = vld [vmem:[%s477_s1 + $0xc0] sm:$0xff]  ;;  %v194_v7 = vld [vmem:[%s477_s1 + $0xc8] sm:$0xff]  ;;  %v191_v8 = vld [vmem:[%s477_s1 + $0xb0] sm:$0xff]  ;;  %s162_s27 = scalar_lea.vmem %s476_s0, %s310_s16  ;;  %s167_s10 = scalar_lea.vmem %s479_s3, %s315_s7 }
   0xe   : > { %208 = vmatpush.msra.mxu0 %v197_v2  ;;  %228 = vmatpush.msra.mxu1 %v198_v3  ;;  %v192_v9 = vld [vmem:[%s477_s1 + $0xb8] sm:$0xff]  ;;  %v189_v10 = vld [vmem:[%s477_s1 + $0xa0] sm:$0xff]  ;;  %v190_v11 = vld [vmem:[%s477_s1 + $0xa8] sm:$0xff] }
   0xf   : > { %v187_v12 = vld [vmem:[%s477_s1 + $0x90] sm:$0xff]  ;;  %v188_v13 = vld [vmem:[%s477_s1 + $0x98] sm:$0xff]  ;;  %v185_v14 = vld [vmem:[%s477_s1 + $0x80] sm:$0xff] }
  0x10   : > { %209 = vmatpush.msra.mxu0 %v195_v4  ;;  %229 = vmatpush.msra.mxu1 %v196_v5  ;;  %v186_v15 = vld [vmem:[%s477_s1 + $0x88] sm:$0xff]  ;;  %v183_v16 = vld [vmem:[%s477_s1 + $0x70] sm:$0xff]  ;;  %v184_v17 = vld [vmem:[%s477_s1 + $0x78] sm:$0xff] }
  0x11   : > { %v181_v18 = vld [vmem:[%s477_s1 + $0x60] sm:$0xff]  ;;  %v182_v19 = vld [vmem:[%s477_s1 + $0x68] sm:$0xff]  ;;  %v179_v20 = vld [vmem:[%s477_s1 + $0x50] sm:$0xff] }
  0x12   : > { %210 = vmatpush.msra.mxu0 %v193_v6  ;;  %230 = vmatpush.msra.mxu1 %v194_v7  ;;  %v180_v21 = vld [vmem:[%s477_s1 + $0x58] sm:$0xff]  ;;  %v177_v22 = vld [vmem:[%s477_s1 + $0x40] sm:$0xff]  ;;  %v178_v23 = vld [vmem:[%s477_s1 + $0x48] sm:$0xff] }
  0x13   : > { %v175_v24 = vld [vmem:[%s477_s1 + $0x30] sm:$0xff]  ;;  %v176_v25 = vld [vmem:[%s477_s1 + $0x38] sm:$0xff]  ;;  %v173_v26 = vld [vmem:[%s477_s1 + $0x20] sm:$0xff] }
  0x14   : > { %211 = vmatpush.msra.mxu0 %v191_v8  ;;  %231 = vmatpush.msra.mxu1 %v192_v9  ;;  %v174_v27 = vld [vmem:[%s477_s1 + $0x28] sm:$0xff]  ;;  %v171_v28 = vld [vmem:[%s477_s1 + $0x10] sm:$0xff]  ;;  %v172_v29 = vld [vmem:[%s477_s1 + $0x18] sm:$0xff] }
  0x15   : > { %v169_v30 = vld [vmem:[%s477_s1] sm:$0xff]  ;;  %v170_v31 = vld [vmem:[%s477_s1 + $0x8] sm:$0xff] }
  0x16   : > { %212 = vmatpush.msra.mxu0 %v189_v10  ;;  %232 = vmatpush.msra.mxu1 %v190_v11  ;;  %v168_v32 = vld [vmem:[%s162_s27] sm:$0xff] }
  0x17   : > { %v201_v33 = vld [vmem:[%s478_s2] sm:$0x3] }
  0x18   : > { %213 = vmatpush.msra.mxu0 %v187_v12  ;;  %233 = vmatpush.msra.mxu1 %v188_v13  ;;  %v203_v34 = vperm.slane %v201_v33, 0  ;;  %v204_v35 = vperm.slane %v201_v33, 1 }
  0x1a   : > { %214 = vmatpush.msra.mxu0 %v185_v14  ;;  %234 = vmatpush.msra.mxu1 %v186_v15 }
  0x1c   : > { %215 = vmatpush.msra.mxu0 %v183_v16  ;;  %235 = vmatpush.msra.mxu1 %v184_v17 }
  0x1e   : > { %216 = vmatpush.msra.mxu0 %v181_v18  ;;  %236 = vmatpush.msra.mxu1 %v182_v19 }
  0x20   : > { %217 = vmatpush.msra.mxu0 %v179_v20  ;;  %237 = vmatpush.msra.mxu1 %v180_v21 }
  0x22   : > { %218 = vmatpush.msra.mxu0 %v177_v22  ;;  %238 = vmatpush.msra.mxu1 %v178_v23 }
  0x24   : > { %219 = vmatpush.msra.mxu0 %v175_v24  ;;  %239 = vmatpush.msra.mxu1 %v176_v25 }
  0x26   : > { %220 = vmatpush.msra.mxu0 %v173_v26  ;;  %240 = vmatpush.msra.mxu1 %v174_v27 }
  0x28   : > { %221 = vmatpush.msra.mxu0 %v171_v28  ;;  %241 = vmatpush.msra.mxu1 %v172_v29 }
  0x2a   : > { %222 = vmatpush.msra.mxu0 %v169_v30  ;;  %242 = vmatpush.msra.mxu1 %v170_v31 }
  0x2b   : > { %223 = vmatmul.f32.vlgmr.msra.gmra.mxu0 %v168_v32  ;;  %243 = vmatmul.f32.vlgmr.msra.gmra.mxu1 %v168_v32 }
  0xa8   : > { %v224_v36 = vpop.f32.mrf.mxu0  ;;  %v244_v37 = vpop.f32.mrf.mxu1 }
  0xa9   : > { %v225_v38 = vadd.f32 %v224_v36, %v203_v34  ;;  %v245_v39 = vadd.f32 %v244_v37, %v204_v35 }
  0xab   : > { %247 = vst [vmem:[%s167_s10] sm:$0xff] %v225_v38 }
  0xac   : > { %249 = vst.msk [vmem:[%s167_s10 + $0x8] sm:$0xff] %vm248_vm0, %v245_v39 }
  0xad PF: > { %s13_s12 = sadd.s32 1, %s330_s12  }
  0xae   : > { %p10_p4 = scmp.ge.s32.totalorder %s13_s12, 4  }
  0xb0   :  { %12 = sbr.rel (!%p10_p4) target bundleno = 1 (0x1), region = 62 }

</bundles_post_ra>
